<compile_context>
chip_gen: v6e
topology: v6e:2x2x1
jax: 0.10.0
libtpu: 0.0.40
codegen_flags: <defaults>
</compile_context>

<pallas_src>
import functools
import math

import jax
import jax.numpy as jnp
from jax import lax
from jax.experimental import pallas as pl
from jax.experimental.pallas import tpu as pltpu

QINT16_MIN, QINT16_MAX = -32768, 32767
_QINFO = {"qint8": (-128, 127), "qint16": (QINT16_MIN, QINT16_MAX)}
TABLE_SIZE = 256
HALF = 128            # slab lane width; TABLE_SIZE == 2 * HALF
NUM_PARAMS = 11       # per-table parameter count in the SMEM vector

# Layout of the packed per-table scalar matrix returned by generate_batch().
SCALARS_LAYOUT = (
    "qint_dense_xmin", "qint_dense_xmax", "qint_sparse_xmin",
    "qint_sparse_xmax", "left_line_xmin", "left_line_ymin", "left_line_xmax",
    "left_line_ymax", "right_line_xmin", "right_line_ymin", "right_line_xmax",
    "right_line_ymax", "qint_left_constant_xmin", "qint_left_constant_xmax",
    "qint_right_constant_xmin", "qint_right_constant_xmax",
    "left_constant_fit_y", "right_constant_fit_y", "final_out_scale")


class _QInfo:
    def __init__(self, lo, hi):
        self.min = lo
        self.max = hi


def qinfo(t):
    lo, hi = _QINFO[t]
    return _QInfo(lo, hi)


def _tables_kernel(params_ref, out_ref, *, func, tables_per_step, use_grid):
    """params_ref (SMEM f32[num_tables * NUM_PARAMS]); per-table layout:
       [0] dense_xmin  [1] dense_xmax  [2] sparse_xmin [3] sparse_xmax
       [4] table_scale [5] left_line_xmin [6] left_line_xmax
       [7] right_line_xmin [8] right_line_xmax
       [9] min_boundary_x [10] max_boundary_x

    out_ref (VMEM f32[tables_per_step, 8, 128]); per-table slab:
       rows 0-1: dense quantized table, rows 2-3: sparse quantized table,
       row 4 lanes 0..5: raw func() at the six boundary points,
       rows 5-7: don't-care padding (dense-grid x, so func sees in-domain
       arguments — no spurious NaN/Inf for log/1/x-like funcs).
    """
    g_count = tables_per_step
    lane_i = lax.broadcasted_iota(jnp.int32, (8, HALF), 1)
    sub = lax.broadcasted_iota(jnp.int32, (8, HALF), 0)
    lane_f = lane_i.astype(jnp.float32)

    # Element index within its 256-entry table (rows 1 / 3 are the high halves).
    idx = lane_f + jnp.where((sub == 1) | (sub == 3), float(HALF), 0.0)
    is_sparse = (sub == 2) | (sub == 3)
    is_table = sub < 4

    base = pl.program_id(0) * (g_count * NUM_PARAMS) if use_grid else 0

    # Static unroll over the tables of this grid step; all EUP/VPU work for the
    # whole block is visible to the scheduler at once.
    for g in range(g_count):
        off = base + g * NUM_PARAMS
        d_min = params_ref[off + 0]
        # Keep the exact divide by (TABLE_SIZE-1) for fidelity to torch.linspace.
        d_step = (params_ref[off + 1] - d_min) / float(TABLE_SIZE - 1)
        s_min = params_ref[off + 2]
        s_step = (params_ref[off + 3] - s_min) / float(TABLE_SIZE - 1)

        x = d_min + idx * d_step
        x = jnp.where(is_sparse, s_min + idx * s_step, x)
        # Row 4, lanes 0..5: scalar evaluation points
        #   0: left_line_xmin  1: left_line_xmax  2: right_line_xmin
        #   3: right_line_xmax 4: min_boundary_x  5: max_boundary_x
        # (VPU where-chain is free filler under EUP slack — kept per review.)
        for j in range(6):
            x = jnp.where((sub == 4) & (lane_i == j), params_ref[off + 5 + j], x)

        y = func(x)  # EUP pass over one vreg; the only busy unit here
        inv_scale = 1.0 / params_ref[off + 4]  # exact reciprocal, hoisted once
        q = jnp.clip(jnp.floor(y * inv_scale + 0.5),
                     float(QINT16_MIN), float(QINT16_MAX))
        out_ref[g] = jnp.where(is_table, q, y)


def _boundaries(ds, *, dense_xmin, dense_xmax, sparse_xmin, sparse_xmax,
                left_line_xmin, left_line_xmax, right_line_xmin,
                right_line_xmax, data_type, min_qint_boundary,
                max_qint_boundary):
    """Device-side clamp_boundary (works on scalar or (N,) data_scale).
    TODO(synk): clamp_boundary/qinfo bodies are not part of the provided
    snippet; this floor/ceil-of-bound/scale + clip reconstruction (and the
    constant-region fill) should be validated against the horizon_plugin
    reference before relying on exact boundary values."""
    min_b = float(min_qint_boundary)
    max_b = float(max_qint_boundary)

    def lo(v):
        return jnp.clip(jnp.floor(v / ds), min_b, max_b)

    def hi(v):
        return jnp.clip(jnp.ceil(v / ds), min_b, max_b)

    qd_min, qd_max = lo(dense_xmin), hi(dense_xmax)
    qs_min, qs_max = lo(sparse_xmin), hi(sparse_xmax)
    qll_min, qll_max = lo(left_line_xmin), hi(left_line_xmax)
    qrl_min, qrl_max = lo(right_line_xmin), hi(right_line_xmax)

    if data_type == "qint8":
        qd_min = jnp.full_like(qd_min, float(qinfo("qint8").min))
        qd_max = jnp.full_like(qd_max, float(qinfo("qint8").max))

    qlc_min = jnp.full_like(qd_min, min_b)
    qlc_max = jnp.maximum(qll_min - 1.0, qlc_min)   # spec: if qlc_max < qlc_min
    qrc_max = jnp.full_like(qd_min, max_b)
    qrc_min = jnp.minimum(qrl_max + 1.0, qrc_max)   # spec: if qrc_min > qrc_max

    return dict(
        qd_min=qd_min, qd_max=qd_max, qs_min=qs_min, qs_max=qs_max,
        qlc_min=qlc_min, qlc_max=qlc_max, qrc_min=qrc_min, qrc_max=qrc_max,
        dxmin=qd_min * ds, dxmax=qd_max * ds,
        sxmin=qs_min * ds, sxmax=qs_max * ds,
        llxmin=qll_min * ds, llxmax=qll_max * ds,
        rlxmin=qrl_min * ds, rlxmax=qrl_max * ds,
        min_bx=min_b * ds, max_bx=max_b * ds,
    )


def _pack_params(b, table_scale):
    """Per-table parameter vector(s): shape (..., NUM_PARAMS) f32."""
    return jnp.stack(
        [b["dxmin"], b["dxmax"], b["sxmin"], b["sxmax"],
         jnp.broadcast_to(table_scale, b["dxmin"].shape),
         b["llxmin"], b["llxmax"], b["rlxmin"], b["rlxmax"],
         b["min_bx"], b["max_bx"]], axis=-1).astype(jnp.float32)


def _device_forward_single(data_scale, out_scale, symmetric_b,
                           out_scale_coefficient, *, func, out_type, **cfg):
    """Spec-compatible single-table forward (grid-less pallas_call)."""
    ds = jnp.asarray(data_scale, jnp.float32)
    osc = jnp.asarray(out_scale, jnp.float32)
    b = _boundaries(ds, **cfg)
    table_scale = osc / 256.0 if out_type == "qint8" else osc
    params = _pack_params(b, table_scale)           # (11,)

    slab = pl.pallas_call(
        functools.partial(_tables_kernel, func=func, tables_per_step=1,
                          use_grid=False),
        out_shape=jax.ShapeDtypeStruct((1, 8, HALF), jnp.float32),
        in_specs=[pl.BlockSpec(memory_space=pltpu.MemorySpace.SMEM)],
        out_specs=pl.BlockSpec(memory_space=pltpu.MemorySpace.VMEM),
    )(params)[0]

    dense_table = slab[0:2].reshape(TABLE_SIZE)
    sparse_table = slab[2:4].reshape(TABLE_SIZE)
    yv = slab[4, 0:6]

    left_line_ymin = yv[0]
    left_line_ymax = yv[1]
    right_line_ymin = yv[2]
    right_line_ymax = yv[3]
    left_constant_fit_y = (yv[4] + yv[0]) * 0.5
    right_constant_fit_y = (yv[5] + yv[3]) * 0.5

    sb = jnp.asarray(symmetric_b, jnp.float32)
    coeff = jnp.asarray(out_scale_coefficient, jnp.float32)
    final_out_scale = osc * coeff
    qint_symmetric_b = jnp.clip(jnp.round(sb / final_out_scale),
                                QINT16_MIN, QINT16_MAX).astype(jnp.int16)

    def i1(v):
        return jnp.reshape(v.astype(jnp.int32), (1,))

    # TODO(synk): if callers always read these back to host, return the packed
    # (tables, scalars, qint_b) form instead of 22 tiny buffers (see
    # generate_batch), which already does this.
    return (dense_table, i1(b["qd_min"]), i1(b["qd_max"]),
            sparse_table, i1(b["qs_min"]), i1(b["qs_max"]),
            b["llxmin"], left_line_ymin, b["llxmax"], left_line_ymax,
            b["rlxmin"], right_line_ymin, b["rlxmax"], right_line_ymax,
            i1(b["qlc_min"]), i1(b["qlc_max"]),
            i1(b["qrc_min"]), i1(b["qrc_max"]),
            left_constant_fit_y, right_constant_fit_y,
            qint_symmetric_b, final_out_scale)


def _device_forward_batched(data_scales, out_scales, symmetric_b,
                            out_scale_coefficient, *, func, out_type,
                            tables_per_step, **cfg):
    """Batched forward: one pallas_call, grid=(ceil(N/G),), G tables/step."""
    ds = jnp.asarray(data_scales, jnp.float32).reshape(-1)
    osc = jnp.asarray(out_scales, jnp.float32).reshape(-1)
    n = ds.shape[0]
    g = max(1, min(tables_per_step, n))
    num_steps = -(-n // g)
    n_pad = num_steps * g

    b = _boundaries(ds, **cfg)
    table_scale = osc / 256.0 if out_type == "qint8" else osc
    params = _pack_params(b, table_scale)            # (n, 11)
    if n_pad > n:
        # Pad with copies of the last row so padded (discarded) tables stay
        # in-domain for func.
        params = jnp.concatenate(
            [params, jnp.tile(params[-1:], (n_pad - n, 1))], axis=0)
    params_flat = params.reshape(n_pad * NUM_PARAMS)  # 1-D SMEM, no 2-D padding

    slabs = pl.pallas_call(
        functools.partial(_tables_kernel, func=func, tables_per_step=g,
                          use_grid=True),
        out_shape=jax.ShapeDtypeStruct((n_pad, 8, HALF), jnp.float32),
        grid=(num_steps,),
        in_specs=[pl.BlockSpec(memory_space=pltpu.MemorySpace.SMEM)],
        out_specs=pl.BlockSpec((g, 8, HALF), lambda i: (i, 0, 0)),
        compiler_params=pltpu.CompilerParams(
            dimension_semantics=("parallel",)),   # v7x: shard over both TCs
    )(params_flat)[:n]

    dense_tables = slabs[:, 0:2, :].reshape(n, TABLE_SIZE)
    sparse_tables = slabs[:, 2:4, :].reshape(n, TABLE_SIZE)
    yv = slabs[:, 4, 0:6]                             # (n, 6)

    ll_ymin, ll_ymax = yv[:, 0], yv[:, 1]
    rl_ymin, rl_ymax = yv[:, 2], yv[:, 3]
    lc_fit_y = (yv[:, 4] + yv[:, 0]) * 0.5
    rc_fit_y = (yv[:, 5] + yv[:, 3]) * 0.5

    sb = jnp.broadcast_to(jnp.asarray(symmetric_b, jnp.float32), (n,))
    coeff = jnp.broadcast_to(
        jnp.asarray(out_scale_coefficient, jnp.float32), (n,))
    final_out_scale = osc * coeff
    qint_symmetric_b = jnp.clip(jnp.round(sb / final_out_scale),
                                QINT16_MIN, QINT16_MAX).astype(jnp.int16)

    # Packed scalar matrix (layout = SCALARS_LAYOUT): one D2H transfer instead
    # of ~20*N tiny ones when the caller reads back.
    scalars = jnp.stack(
        [b["qd_min"], b["qd_max"], b["qs_min"], b["qs_max"],
         b["llxmin"], ll_ymin, b["llxmax"], ll_ymax,
         b["rlxmin"], rl_ymin, b["rlxmax"], rl_ymax,
         b["qlc_min"], b["qlc_max"], b["qrc_min"], b["qrc_max"],
         lc_fit_y, rc_fit_y, final_out_scale], axis=-1)   # (n, 19)

    return dense_tables, sparse_tables, scalars, qint_symmetric_b


class MultiTableGenerator:
    def __init__(self, func, dense_xmin, dense_xmax, sparse_xmin, sparse_xmax,
                 left_line_xmin, left_line_xmax, right_line_xmin,
                 right_line_xmax, out_type, is_symmetric, tables_per_step=8):
        self.func = func
        self.out_type = out_type
        self.iinfo = qinfo(out_type)
        self.dense_xmin = dense_xmin
        self.dense_xmax = dense_xmax
        self.sparse_xmin = sparse_xmin
        self.sparse_xmax = sparse_xmax
        self.left_line_xmin = left_line_xmin
        self.left_line_xmax = left_line_xmax
        self.right_line_xmin = right_line_xmin
        self.right_line_xmax = right_line_xmax
        self.is_symmetric = is_symmetric
        self.tables_per_step = tables_per_step     # tables per grid step (batched)
        self._single_cache = {}
        self._batched_cache = {}

    def _cfg(self, data_type, min_b, max_b):
        return dict(
            dense_xmin=self.dense_xmin, dense_xmax=self.dense_xmax,
            sparse_xmin=self.sparse_xmin, sparse_xmax=self.sparse_xmax,
            left_line_xmin=self.left_line_xmin,
            left_line_xmax=self.left_line_xmax,
            right_line_xmin=self.right_line_xmin,
            right_line_xmax=self.right_line_xmax,
            data_type=data_type,
            min_qint_boundary=int(min_b), max_qint_boundary=int(max_b))

    def _get_single_fn(self, data_type, min_b, max_b):
        key = (data_type, int(min_b), int(max_b))
        fn = self._single_cache.get(key)
        if fn is None:
            fn = jax.jit(functools.partial(
                _device_forward_single, func=self.func,
                out_type=self.out_type, **self._cfg(data_type, min_b, max_b)))
            self._single_cache[key] = fn
        return fn

    def _get_batched_fn(self, data_type, min_b, max_b):
        key = (data_type, int(min_b), int(max_b))
        fn = self._batched_cache.get(key)
        if fn is None:
            fn = jax.jit(functools.partial(
                _device_forward_batched, func=self.func,
                out_type=self.out_type, tables_per_step=self.tables_per_step,
                **self._cfg(data_type, min_b, max_b)))
            self._batched_cache[key] = fn
        return fn

    def __call__(self, data_scale, out_scale, data_type, min_qint_boundary,
                 max_qint_boundary, symmetric_b=0.0, out_scale_coefficient=1.0):
        """Spec-compatible forward: returns the 22-element tuple."""
        if self.is_symmetric:
            min_qint_boundary = 0
        fn = self._get_single_fn(data_type, min_qint_boundary, max_qint_boundary)
        return fn(data_scale, out_scale, symmetric_b, out_scale_coefficient)

    def generate_batch(self, data_scales, out_scales, data_type,
                       min_qint_boundary, max_qint_boundary,
                       symmetric_b=0.0, out_scale_coefficient=1.0):
        """Batched generation (calibration loops): one pallas_call over all N
        tables.  Returns (dense_tables (N,256), sparse_tables (N,256),
        scalars (N,19) per SCALARS_LAYOUT, qint_symmetric_b (N,) int16)."""
        if self.is_symmetric:
            min_qint_boundary = 0
        fn = self._get_batched_fn(data_type, min_qint_boundary, max_qint_boundary)
        return fn(data_scales, out_scales, symmetric_b, out_scale_coefficient)


if __name__ == "__main__":
    import numpy as np

    key = jax.random.PRNGKey(0)
    k1, k2, k3, k4 = jax.random.split(key, 4)
    data_scale = (jax.random.uniform(k1, ()) * 0.01 + 0.05).astype(jnp.float32)
    out_scale = (jax.random.uniform(k2, ()) * 0.001 + 0.001).astype(jnp.float32)

    gen = MultiTableGenerator(
        func=jnp.tanh,
        dense_xmin=-4.0, dense_xmax=4.0,
        sparse_xmin=-8.0, sparse_xmax=8.0,
        left_line_xmin=-16.0, left_line_xmax=-8.0,
        right_line_xmin=8.0, right_line_xmax=16.0,
        out_type="qint16", is_symmetric=False,
        tables_per_step=4)   # small G so the demo batch exercises 2 grid steps

    # --- single-table (spec-compatible) path ------------------------------
    outs = gen(data_scale, out_scale, data_type="qint16",
               min_qint_boundary=QINT16_MIN, max_qint_boundary=QINT16_MAX,
               symmetric_b=0.25, out_scale_coefficient=1.0)
    outs = jax.block_until_ready(outs)

    dense_table, sparse_table = outs[0], outs[3]
    assert dense_table.shape == (TABLE_SIZE,)
    assert sparse_table.shape == (TABLE_SIZE,)
    assert bool(jnp.all(dense_table >= QINT16_MIN))
    assert bool(jnp.all(dense_table <= QINT16_MAX))
    # tanh is monotone -> quantized tables must be non-decreasing.
    assert bool(jnp.all(jnp.diff(dense_table) >= 0))
    assert bool(jnp.all(jnp.diff(sparse_table) >= 0))
    assert outs[20].dtype == jnp.int16

    # Reference check for the dense table (host readback is test-only).
    ds_f = float(data_scale)
    os_f = float(out_scale)
    qd_min = min(max(math.floor(-4.0 / ds_f), QINT16_MIN), QINT16_MAX)
    qd_max = max(min(math.ceil(4.0 / ds_f), QINT16_MAX), QINT16_MIN)
    xs = np.linspace(qd_min * ds_f, qd_max * ds_f, TABLE_SIZE)
    ref = np.clip(np.floor(np.tanh(xs) / os_f + 0.5), QINT16_MIN, QINT16_MAX)
    assert np.max(np.abs(np.asarray(dense_table, np.float64) - ref)) <= 1.01
    # Boundary func values: left_line_ymin == tanh(left_line_xmin).
    assert abs(float(outs[7]) - math.tanh(float(outs[6]))) < 1e-4

    # --- batched path (one pallas_call, grid over tables) -----------------
    N = 5
    ds_b = (jax.random.uniform(k3, (N,)) * 0.01 + 0.04).astype(jnp.float32)
    os_b = (jax.random.uniform(k4, (N,)) * 0.001 + 0.001).astype(jnp.float32)
    ds_b = ds_b.at[0].set(data_scale)
    os_b = os_b.at[0].set(out_scale)

    dt, st, scal, qsb = gen.generate_batch(
        ds_b, os_b, data_type="qint16",
        min_qint_boundary=QINT16_MIN, max_qint_boundary=QINT16_MAX,
        symmetric_b=0.25, out_scale_coefficient=1.0)
    dt, st, scal, qsb = jax.block_until_ready((dt, st, scal, qsb))

    assert dt.shape == (N, TABLE_SIZE) and st.shape == (N, TABLE_SIZE)
    assert scal.shape == (N, len(SCALARS_LAYOUT))
    assert qsb.shape == (N,) and qsb.dtype == jnp.int16
    assert bool(jnp.all(jnp.diff(dt, axis=1) >= 0))
    assert bool(jnp.all(jnp.diff(st, axis=1) >= 0))
    # Table 0 of the batch must match the single-table path (same scales).
    assert float(jnp.max(jnp.abs(dt[0] - dense_table))) <= 1.0
    assert float(jnp.max(jnp.abs(st[0] - sparse_table))) <= 1.0
    # Packed scalars consistent with the single-path outputs.
    assert int(scal[0, 0]) == int(outs[1][0])          # qint_dense_xmin
    assert int(scal[0, 1]) == int(outs[2][0])          # qint_dense_xmax
    assert abs(float(scal[0, 18]) - os_f) < 1e-8       # final_out_scale

    print("KERNEL_OK")
</pallas_src>

<mosaic_0001>
module attributes {stable_mosaic.version = 11 : i64} {
  func.func @_tables_kernel(%arg0: memref<11xf32, #tpu.memory_space<smem>>, %arg1: memref<1x8x128xf32, #tpu.memory_space<vmem>>) attributes {dimension_semantics = [], scalar_prefetch = 0 : i64, scratch_operands = 0 : i64, tpu.core_type = #tpu.core_type<tc>} {
    %0 = tpu.iota {dimensions = array<i32: 1>} : vector<8x128xi32>
    %1 = tpu.iota {dimensions = array<i32: 0>} : vector<8x128xi32>
    %2 = arith.sitofp %0 : vector<8x128xi32> to vector<8x128xf32>
    %c1_i32 = arith.constant 1 : i32
    %3 = vector.broadcast %c1_i32 : i32 to vector<8x128xi32>
    %4 = arith.cmpi eq, %1, %3 : vector<8x128xi32>
    %c3_i32 = arith.constant 3 : i32
    %5 = vector.broadcast %c3_i32 : i32 to vector<8x128xi32>
    %6 = arith.cmpi eq, %1, %5 : vector<8x128xi32>
    %7 = arith.ori %4, %6 : vector<8x128xi1>
    %cst = arith.constant 1.280000e+02 : f32
    %cst_0 = arith.constant 0.000000e+00 : f32
    %8 = vector.broadcast %cst : f32 to vector<8x128xf32>
    %9 = vector.broadcast %cst_0 : f32 to vector<8x128xf32>
    %10 = arith.select %7, %8, %9 : vector<8x128xi1>, vector<8x128xf32>
    %11 = arith.addf %2, %10 : vector<8x128xf32>
    %c2_i32 = arith.constant 2 : i32
    %12 = vector.broadcast %c2_i32 : i32 to vector<8x128xi32>
    %13 = arith.cmpi eq, %1, %12 : vector<8x128xi32>
    %c3_i32_1 = arith.constant 3 : i32
    %14 = vector.broadcast %c3_i32_1 : i32 to vector<8x128xi32>
    %15 = arith.cmpi eq, %1, %14 : vector<8x128xi32>
    %16 = arith.ori %13, %15 : vector<8x128xi1>
    %c4_i32 = arith.constant 4 : i32
    %17 = vector.broadcast %c4_i32 : i32 to vector<8x128xi32>
    %18 = arith.cmpi slt, %1, %17 : vector<8x128xi32>
    %c0 = arith.constant 0 : index
    %19 = memref.load %arg0[%c0] : memref<11xf32, #tpu.memory_space<smem>>
    %c1 = arith.constant 1 : index
    %20 = memref.load %arg0[%c1] : memref<11xf32, #tpu.memory_space<smem>>
    %21 = arith.subf %20, %19 : f32
    %cst_2 = arith.constant 2.550000e+02 : f32
    %22 = arith.divf %21, %cst_2 : f32
    %c2 = arith.constant 2 : index
    %23 = memref.load %arg0[%c2] : memref<11xf32, #tpu.memory_space<smem>>
    %c3 = arith.constant 3 : index
    %24 = memref.load %arg0[%c3] : memref<11xf32, #tpu.memory_space<smem>>
    %25 = arith.subf %24, %23 : f32
    %cst_3 = arith.constant 2.550000e+02 : f32
    %26 = arith.divf %25, %cst_3 : f32
    %27 = vector.broadcast %22 : f32 to vector<8x128xf32>
    %28 = arith.mulf %11, %27 : vector<8x128xf32>
    %29 = vector.broadcast %19 : f32 to vector<8x128xf32>
    %30 = arith.addf %29, %28 : vector<8x128xf32>
    %31 = vector.broadcast %26 : f32 to vector<8x128xf32>
    %32 = arith.mulf %11, %31 : vector<8x128xf32>
    %33 = vector.broadcast %23 : f32 to vector<8x128xf32>
    %34 = arith.addf %33, %32 : vector<8x128xf32>
    %35 = arith.select %16, %34, %30 : vector<8x128xi1>, vector<8x128xf32>
    %c4_i32_4 = arith.constant 4 : i32
    %36 = vector.broadcast %c4_i32_4 : i32 to vector<8x128xi32>
    %37 = arith.cmpi eq, %1, %36 : vector<8x128xi32>
    %c0_i32 = arith.constant 0 : i32
    %38 = vector.broadcast %c0_i32 : i32 to vector<8x128xi32>
    %39 = arith.cmpi eq, %0, %38 : vector<8x128xi32>
    %40 = arith.andi %37, %39 : vector<8x128xi1>
    %c5 = arith.constant 5 : index
    %41 = memref.load %arg0[%c5] : memref<11xf32, #tpu.memory_space<smem>>
    %42 = vector.broadcast %41 : f32 to vector<8x128xf32>
    %43 = arith.select %40, %42, %35 : vector<8x128xi1>, vector<8x128xf32>
    %c4_i32_5 = arith.constant 4 : i32
    %44 = vector.broadcast %c4_i32_5 : i32 to vector<8x128xi32>
    %45 = arith.cmpi eq, %1, %44 : vector<8x128xi32>
    %c1_i32_6 = arith.constant 1 : i32
    %46 = vector.broadcast %c1_i32_6 : i32 to vector<8x128xi32>
    %47 = arith.cmpi eq, %0, %46 : vector<8x128xi32>
    %48 = arith.andi %45, %47 : vector<8x128xi1>
    %c6 = arith.constant 6 : index
    %49 = memref.load %arg0[%c6] : memref<11xf32, #tpu.memory_space<smem>>
    %50 = vector.broadcast %49 : f32 to vector<8x128xf32>
    %51 = arith.select %48, %50, %43 : vector<8x128xi1>, vector<8x128xf32>
    %c4_i32_7 = arith.constant 4 : i32
    %52 = vector.broadcast %c4_i32_7 : i32 to vector<8x128xi32>
    %53 = arith.cmpi eq, %1, %52 : vector<8x128xi32>
    %c2_i32_8 = arith.constant 2 : i32
    %54 = vector.broadcast %c2_i32_8 : i32 to vector<8x128xi32>
    %55 = arith.cmpi eq, %0, %54 : vector<8x128xi32>
    %56 = arith.andi %53, %55 : vector<8x128xi1>
    %c7 = arith.constant 7 : index
    %57 = memref.load %arg0[%c7] : memref<11xf32, #tpu.memory_space<smem>>
    %58 = vector.broadcast %57 : f32 to vector<8x128xf32>
    %59 = arith.select %56, %58, %51 : vector<8x128xi1>, vector<8x128xf32>
    %c4_i32_9 = arith.constant 4 : i32
    %60 = vector.broadcast %c4_i32_9 : i32 to vector<8x128xi32>
    %61 = arith.cmpi eq, %1, %60 : vector<8x128xi32>
    %c3_i32_10 = arith.constant 3 : i32
    %62 = vector.broadcast %c3_i32_10 : i32 to vector<8x128xi32>
    %63 = arith.cmpi eq, %0, %62 : vector<8x128xi32>
    %64 = arith.andi %61, %63 : vector<8x128xi1>
    %c8 = arith.constant 8 : index
    %65 = memref.load %arg0[%c8] : memref<11xf32, #tpu.memory_space<smem>>
    %66 = vector.broadcast %65 : f32 to vector<8x128xf32>
    %67 = arith.select %64, %66, %59 : vector<8x128xi1>, vector<8x128xf32>
    %c4_i32_11 = arith.constant 4 : i32
    %68 = vector.broadcast %c4_i32_11 : i32 to vector<8x128xi32>
    %69 = arith.cmpi eq, %1, %68 : vector<8x128xi32>
    %c4_i32_12 = arith.constant 4 : i32
    %70 = vector.broadcast %c4_i32_12 : i32 to vector<8x128xi32>
    %71 = arith.cmpi eq, %0, %70 : vector<8x128xi32>
    %72 = arith.andi %69, %71 : vector<8x128xi1>
    %c9 = arith.constant 9 : index
    %73 = memref.load %arg0[%c9] : memref<11xf32, #tpu.memory_space<smem>>
    %74 = vector.broadcast %73 : f32 to vector<8x128xf32>
    %75 = arith.select %72, %74, %67 : vector<8x128xi1>, vector<8x128xf32>
    %c4_i32_13 = arith.constant 4 : i32
    %76 = vector.broadcast %c4_i32_13 : i32 to vector<8x128xi32>
    %77 = arith.cmpi eq, %1, %76 : vector<8x128xi32>
    %c5_i32 = arith.constant 5 : i32
    %78 = vector.broadcast %c5_i32 : i32 to vector<8x128xi32>
    %79 = arith.cmpi eq, %0, %78 : vector<8x128xi32>
    %80 = arith.andi %77, %79 : vector<8x128xi1>
    %c10 = arith.constant 10 : index
    %81 = memref.load %arg0[%c10] : memref<11xf32, #tpu.memory_space<smem>>
    %82 = vector.broadcast %81 : f32 to vector<8x128xf32>
    %83 = arith.select %80, %82, %75 : vector<8x128xi1>, vector<8x128xf32>
    %84 = math.tanh %83 : vector<8x128xf32>
    %c4 = arith.constant 4 : index
    %85 = memref.load %arg0[%c4] : memref<11xf32, #tpu.memory_space<smem>>
    %cst_14 = arith.constant 1.000000e+00 : f32
    %86 = arith.divf %cst_14, %85 : f32
    %87 = vector.broadcast %86 : f32 to vector<8x128xf32>
    %88 = arith.mulf %84, %87 : vector<8x128xf32>
    %cst_15 = arith.constant 5.000000e-01 : f32
    %89 = vector.broadcast %cst_15 : f32 to vector<8x128xf32>
    %90 = arith.addf %88, %89 : vector<8x128xf32>
    %91 = math.floor %90 : vector<8x128xf32>
    %cst_16 = arith.constant -3.276800e+04 : f32
    %cst_17 = arith.constant 3.276700e+04 : f32
    %92 = vector.broadcast %cst_16 : f32 to vector<8x128xf32>
    %93 = arith.maximumf %92, %91 : vector<8x128xf32>
    %94 = vector.broadcast %cst_17 : f32 to vector<8x128xf32>
    %95 = arith.minimumf %94, %93 : vector<8x128xf32>
    %96 = arith.select %18, %95, %84 : vector<8x128xi1>, vector<8x128xf32>
    %c0_18 = arith.constant 0 : index
    %c0_19 = arith.constant 0 : index
    %c0_20 = arith.constant 0 : index
    %97 = vector.load %arg1[%c0_18, %c0_19, %c0_20] : memref<1x8x128xf32, #tpu.memory_space<vmem>>, vector<1x8x128xf32>
    %98 = vector.shape_cast %97 : vector<1x8x128xf32> to vector<8x128xf32>
    %99 = vector.shape_cast %96 : vector<8x128xf32> to vector<1x8x128xf32>
    tpu.vector_store %arg1[%c0_18, %c0_19, %c0_20], %99 {strides = array<i32>} : memref<1x8x128xf32, #tpu.memory_space<vmem>>, vector<1x8x128xf32>,
    return
  }
}

</mosaic_0001>

<bundles_post_ra>
// kernel: _device_forward_single.1
= control target key start
LH: loop header
LB: loop body
LE: loop exit
PB: predicated region body
PF: predicated region fallthrough
CT: control target
= control target key end

     0   :  { %6 = vsyncpa [#allocation3], 0  ;;  %s181_s0 = inlined_call_operand.vmem [shape: f32[11], index: 0, kind: input, shape index: {}]   ;;  %s182_s1 = inlined_call_operand.vmem [shape: f32[1,8,128], index: 1, kind: output, shape index: {}]  }
   0x1   :  { %s13_s8 = sshll.u32 %s181_s0, 4  ;;  %s14_s8 = int_to_ptr.vmem [resolvable:$true] %s13_s8 }
   0x2   :  { %s122_s9 = scalar_lea.vmem %s14_s8, 16  ;;  %p127_p1 = scmp.lt.s32.totalorder %s14_s8, %s14_s8 }
   0x3   :  { %p123_p0 = scmp.ne.s32.totalorder %s14_s8, %s122_s9  ;;  %p128_p2 = scmp.lt.s32.totalorder %s122_s9, %s122_s9 }
   0x5   :  { %p129_p3 = por %p128_p2, %p127_p1 }
   0x7   :  { %p130_p4 = pnand %p129_p3, %p123_p0 }
   0x9   :  { %133 = shalt.err (!%p130_p4)
}
   0xa   :  { %s136_s10 = smov [#allocation2]  }
   0xb   :  { %16 = dma.vmem_to_smem %s14_s8, 16, %s136_s10, [#allocation3]  }
   0xc   :  { %134 = dma.done.wait [#allocation3], 16  }
   0xd   :  { %135 = vsyncadd [#allocation3], 4294967280 }
   0xe   :  { %20 = sfence }
   0xf   :  { %s113_s11 = sld [smem:[#allocation2 + $0x4]]  ;;  %v21_v1 = vlaneseq  ;;  %v137_v6 = vmov 0.0  }
  0x10   :  { %s151_s12 = sld [smem:[#allocation2]] }
  0x11   :  { %s104_s0 = sld [smem:[#allocation2 + $0x1]]  ;;  %v153_v2 = vshrl.u32 %v21_v1, 7  ;;  %v22_v3 = vand.u32 127, %v21_v1 }
  0x12   :  { %s105_s13 = sld [smem:[#allocation2 + $0x2]] }
  0x13   :  { %s106_s14 = sld [smem:[#allocation2 + $0x3]]  ;;  %vm26_vm0 = vcmp.eq.s32.totalorder %v153_v2, 1  ;;  %vm27_vm1 = vcmp.eq.s32.totalorder %v153_v2, 3  ;;  %v25_v4 = vcvt.s32.f32 %v22_v3  ;;  %vm31_vm3 = vcmp.eq.s32.totalorder %v153_v2, 2 }
  0x14   :  { %vm28_vm2 = vmor %vm26_vm0, %vm27_vm1  ;;  %s107_s19 = sld [smem:[#allocation2 + $0x5]]  ;;  %vm55_vm5 = vcmp.eq.s32.totalorder %v153_v2, 4  ;;  %vm56_vm6 = vcmp.eq.s32.totalorder %v22_v3, 0  ;;  %vm61_vm8 = vcmp.eq.s32.totalorder %v22_v3, 1  ;;  %vm66_vm10 = vcmp.eq.s32.totalorder %v22_v3, 2 }
  0x15   :  { %v88_v0 = vstv %s113_s11  ;;  %v29_v7 = vsel %vm28_vm2, 128.0, %v137_v6  ;;  %s108_s20 = sld [smem:[#allocation2 + $0x6]]  ;;  %vm32_vm4 = vmor %vm31_vm3, %vm27_vm1  ;;  %vm71_vm12 = vcmp.eq.s32.totalorder %v22_v3, 3  ;;  %vm76_vm14 = vcmp.eq.s32.totalorder %v22_v3, 4 }
  0x16   :  { %118 = vrcp.f32 %v88_v0  ;;  %v30_v8 = vadd.f32 %v29_v7, %v25_v4  ;;  %v48_v13 = vstv %s151_s12  ;;  %s109_s21 = sld [smem:[#allocation2 + $0x7]]  ;;  %vm57_vm7 = vmand %vm55_vm5, %vm56_vm6  ;;  %vm81_vm0 = vcmp.eq.s32.totalorder %v22_v3, 5 }
  0x17   :  { %s36_s15 = ssub.f32 %s104_s0, %s151_s12  ;;  %vm62_vm9 = vmand %vm55_vm5, %vm61_vm8  ;;  %vm33_vm2 = vcmp.lt.s32.totalorder %v153_v2, 4 }
  0x18   :  { %v52_v14 = vstv %s105_s13  ;;  %s110_s22 = sld [smem:[#allocation2 + $0x8]]  ;;  %vm67_vm11 = vmand %vm55_vm5, %vm66_vm10 }
  0x19   :  { %s42_s16 = ssub.f32 %s106_s14, %s105_s13  ;;  %s39_s17 = smul.f32 0.003921569, %s36_s15  ;;  %vm72_vm13 = vmand %vm55_vm5, %vm71_vm12 }
  0x1a   :  { %v59_v18 = vstv %s107_s19  ;;  %s111_s23 = sld [smem:[#allocation2 + $0x9]]  ;;  %vm77_vm15 = vmand %vm55_vm5, %vm76_vm14 }
  0x1b   :  { %s45_s18 = smul.f32 0.003921569, %s42_s16  ;;  %v46_v9 = vstv %s39_s17  ;;  %v64_v20 = vstv %s108_s20  ;;  %s112_s24 = sld [smem:[#allocation2 + $0xa]]  ;;  %vm82_vm1 = vmand %vm55_vm5, %vm81_vm0 }
  0x1c   :  { %v47_v11 = vmul.f32 %v46_v9, %v30_v8  ;;  %v69_v22 = vstv %s109_s21 }
  0x1d   :  { %v50_v10 = vstv %s45_s18 }
  0x1e   :  { %v51_v12 = vmul.f32 %v50_v10, %v30_v8  ;;  %v49_v15 = vadd.f32 %v48_v13, %v47_v11  ;;  %v74_v24 = vstv %s110_s22 }
  0x20   :  { %v53_v16 = vadd.f32 %v52_v14, %v51_v12  ;;  %v79_v26 = vstv %s111_s23 }
  0x21   :  { %v84_v28 = vstv %s112_s24 }
  0x22   :  { %v54_v17 = vsel %vm32_vm4, %v53_v16, %v49_v15 }
  0x23   :  { %v119_v5 = vpop.eup %118  ;;  %v60_v19 = vsel %vm57_vm7, %v59_v18, %v54_v17 }
  0x24   :  { %114 = vpush %v119_v5  ;;  %v65_v21 = vsel %vm62_vm9, %v64_v20, %v60_v19 }
  0x25   :  { %v70_v23 = vsel %vm67_vm11, %v69_v22, %v65_v21 }
  0x26   :  { %v75_v25 = vsel %vm72_vm13, %v74_v24, %v70_v23 }
  0x27   :  { %v80_v27 = vsel %vm77_vm15, %v79_v26, %v75_v25 }
  0x28   :  { %v85_v29 = vsel %vm82_vm1, %v84_v28, %v80_v27 }
  0x29   :  { %120 = vtanh.f32 %v85_v29 }
  0x36   :  { %v121_v30 = vpop.eup %120 }
  0x55   :  { %s115_s25 = spop %114 }
  0x56   :  { %v91_v31 = vstv %s115_s25 }
  0x57   :  { %v92_v32 = vmul.f32 %v121_v30, %v91_v31 }
  0x59   :  { %v93_v33 = vadd.f32 0.5, %v92_v32 }
  0x5b   :  { %v94_v34 = vfloor.f32 %v93_v33 }
  0x5d   :  { %v95_v35 = vmax.f32 %v94_v34, -32768.0 }
  0x5f   :  { %v96_v36 = vmin.f32 %v95_v35, 32767.0 }
  0x61   :  { %v97_v37 = vsel %vm33_vm2, %v96_v36, %v121_v30 }
  0x62   :  { %98 = vst [vmem:[%s182_s1] sm:$0xff] %v97_v37 }
  0x63   :  { %103 = vsyncpa [#allocation3], 1 }

</bundles_post_ra>
